<compile_context>
chip_gen: v6e
topology: v6e:2x2x1
jax: 0.10.0
libtpu: 0.0.40
codegen_flags: <defaults>
</compile_context>

<pallas_src>
import jax
import jax.numpy as jnp
from jax.experimental import pallas as pl
from jax.experimental.pallas import tpu as pltpu


def _round_up(n, m):
    return ((n + m - 1) // m) * m


def mlp_kernel(xT_ref, w1_ref, b1_ref, w2_ref, b2_ref, w3_ref, b3_ref, oT_ref):
    """One batch tile, fully fused.  Everything is feature-major (batch on lanes):

        h1 = relu(W1 @ x^T + b1)     (h1, tile_m)
        h2 = relu(W2 @ h1  + b2)     (h2, tile_m)
        y^T =      W3 @ h2  + b3     (out, tile_m)   -- lane-dense store
    """
    xT = xT_ref[...]                                                   # (in,  tm)
    h1 = jnp.dot(w1_ref[...], xT, preferred_element_type=jnp.float32)  # (h1,  tm)
    h1 = jnp.maximum(h1 + b1_ref[...], 0.0)
    h2 = jnp.dot(w2_ref[...], h1, preferred_element_type=jnp.float32)  # (h2,  tm)
    h2 = jnp.maximum(h2 + b2_ref[...], 0.0)
    yT = jnp.dot(w3_ref[...], h2, preferred_element_type=jnp.float32)  # (out, tm)
    oT_ref[...] = (yT + b3_ref[...]).astype(oT_ref.dtype)


def prepare_params(params):
    """One-time conversion from PyTorch Linear params to kernel layout.

    Weights stay in PyTorch (out, in) layout (used directly by the transposed
    formulation); biases become column vectors so they broadcast over lanes.
    """
    return {
        "w1": params["fc1_w"],            # (h1, in)
        "b1": params["fc1_b"][:, None],   # (h1, 1)
        "w2": params["fc2_w"],            # (h2, h1)
        "b2": params["fc2_b"][:, None],   # (h2, 1)
        "w3": params["fc3_w"],            # (out, h2)
        "b3": params["fc3_b"][:, None],   # (out, 1)
    }


def complex_regressor_forward(x, prep, *, tile_m=512):
    """x: (B, input_size) float32. prep: output of prepare_params()."""
    B, in_size = x.shape
    out_size = prep["w3"].shape[0]

    # Row tile: multiple of 128 (lane width), capped for small batches.
    tile = min(tile_m, _round_up(max(B, 1), 128))
    assert tile % 128 == 0
    Bp = _round_up(B, tile)
    n_tiles = Bp // tile

    # Feature-major input, zero-padded to a whole number of tiles.
    xT = jnp.pad(x.T, ((0, 0), (0, Bp - B)))                  # (in, Bp)

    # Parameters: full-array blocks with constant block index -> VMEM-resident.
    resident = lambda a: pl.BlockSpec(a.shape, lambda i: (0,) * a.ndim)

    outT = pl.pallas_call(
        mlp_kernel,
        out_shape=jax.ShapeDtypeStruct((out_size, Bp), jnp.float32),
        grid=(n_tiles,),
        in_specs=[
            pl.BlockSpec((in_size, tile), lambda i: (0, i)),   # x^T batch tile
            resident(prep["w1"]), resident(prep["b1"]),
            resident(prep["w2"]), resident(prep["b2"]),
            resident(prep["w3"]), resident(prep["b3"]),
        ],
        out_specs=pl.BlockSpec((out_size, tile), lambda i: (0, i)),
        compiler_params=pltpu.CompilerParams(
            dimension_semantics=("parallel",),                 # megacore on v7x
        ),
    )(xT, prep["w1"], prep["b1"], prep["w2"], prep["b2"], prep["w3"], prep["b3"])

    return outT[:, :B].T                                       # (B, out_size)


def init_params(key, input_size, hidden1, hidden2, output_size):
    """Deterministic synthetic init (PyTorch Linear shapes: W=(out,in), b=(out,))."""
    ks = jax.random.split(key, 6)

    def lin(kw, kb, fan_in, fan_out):
        bound = 1.0 / jnp.sqrt(fan_in)
        w = jax.random.uniform(kw, (fan_out, fan_in), jnp.float32, -bound, bound)
        b = jax.random.uniform(kb, (fan_out,), jnp.float32, -bound, bound)
        return w, b

    w1, b1 = lin(ks[0], ks[1], input_size, hidden1)
    w2, b2 = lin(ks[2], ks[3], hidden1, hidden2)
    w3, b3 = lin(ks[4], ks[5], hidden2, output_size)
    return {"fc1_w": w1, "fc1_b": b1,
            "fc2_w": w2, "fc2_b": b2,
            "fc3_w": w3, "fc3_b": b3}


def reference_forward(x, params):
    h1 = jnp.maximum(x @ params["fc1_w"].T + params["fc1_b"], 0.0)
    h2 = jnp.maximum(h1 @ params["fc2_w"].T + params["fc2_b"], 0.0)
    return h2 @ params["fc3_w"].T + params["fc3_b"]


if __name__ == "__main__":
    # Abalone: 8 input features, regression output of size 1.
    input_size, hidden1, hidden2, output_size = 8, 64, 32, 1
    batch = 1024   # two 512-row tiles -> exercises the parallel batch grid

    key = jax.random.PRNGKey(0)
    kx, kp = jax.random.split(key)
    x = jax.random.normal(kx, (batch, input_size), jnp.float32)
    params = init_params(kp, input_size, hidden1, hidden2, output_size)
    prep = prepare_params(params)   # hoisted: done once, not per forward call

    fwd = jax.jit(complex_regressor_forward)
    out = fwd(x, prep)
    jax.block_until_ready(out)

    ref = reference_forward(x, params)
    assert out.shape == (batch, output_size)
    assert jnp.allclose(out, ref, atol=1e-4, rtol=1e-4), "mismatch vs reference"

    print("KERNEL_OK")
</pallas_src>

<mosaic_0001>
module attributes {stable_mosaic.version = 11 : i64} {
  func.func @mlp_kernel(%arg0: i32, %arg1: memref<8x512xf32, #tpu.memory_space<vmem>>, %arg2: memref<64x8xf32, #tpu.memory_space<vmem>>, %arg3: memref<64x1xf32, #tpu.memory_space<vmem>>, %arg4: memref<32x64xf32, #tpu.memory_space<vmem>>, %arg5: memref<32x1xf32, #tpu.memory_space<vmem>>, %arg6: memref<1x32xf32, #tpu.memory_space<vmem>>, %arg7: memref<1x1xf32, #tpu.memory_space<vmem>>, %arg8: memref<1x512xf32, #tpu.memory_space<vmem>>) attributes {dimension_semantics = [#tpu.dimension_semantics<parallel>], iteration_bounds = array<i64: 2>, scalar_prefetch = 0 : i64, scratch_operands = 0 : i64, tpu.core_type = #tpu.core_type<tc>, window_params = [{transform_indices = @transform_0, window_bounds = array<i64: 8, 512>}, {pipeline_mode = #tpu.pipeline_mode<synchronous>, transform_indices = @transform_1, window_bounds = array<i64: 64, 8>}, {pipeline_mode = #tpu.pipeline_mode<synchronous>, transform_indices = @transform_2, window_bounds = array<i64: 64, 1>}, {pipeline_mode = #tpu.pipeline_mode<synchronous>, transform_indices = @transform_3, window_bounds = array<i64: 32, 64>}, {pipeline_mode = #tpu.pipeline_mode<synchronous>, transform_indices = @transform_4, window_bounds = array<i64: 32, 1>}, {pipeline_mode = #tpu.pipeline_mode<synchronous>, transform_indices = @transform_5, window_bounds = array<i64: 1, 32>}, {pipeline_mode = #tpu.pipeline_mode<synchronous>, transform_indices = @transform_6, window_bounds = array<i64: 1, 1>}, {transform_indices = @transform_7, window_bounds = array<i64: 1, 512>}]} {
    %c0 = arith.constant 0 : index
    %c0_0 = arith.constant 0 : index
    %0 = vector.load %arg1[%c0, %c0_0] : memref<8x512xf32, #tpu.memory_space<vmem>>, vector<8x512xf32>
    %c0_1 = arith.constant 0 : index
    %c0_2 = arith.constant 0 : index
    %1 = vector.load %arg2[%c0_1, %c0_2] : memref<64x8xf32, #tpu.memory_space<vmem>>, vector<64x8xf32>
    %cst = arith.constant dense<0.000000e+00> : vector<64x512xf32>
    %2 = tpu.matmul %1, %0, %cst {dimension_numbers = #tpu.dot_dimension_numbers<[1], [0], [0], [1], [0, 0, 1, 1], [], []>} : vector<64x8xf32>, vector<8x512xf32>, vector<64x512xf32> -> vector<64x512xf32>
    %c0_3 = arith.constant 0 : index
    %c0_4 = arith.constant 0 : index
    %3 = vector.load %arg3[%c0_3, %c0_4] : memref<64x1xf32, #tpu.memory_space<vmem>>, vector<64x1xf32>
    %4 = vector.broadcast %3 : vector<64x1xf32> to vector<64x512xf32>
    %5 = arith.addf %2, %4 : vector<64x512xf32>
    %cst_5 = arith.constant 0.000000e+00 : f32
    %6 = vector.broadcast %cst_5 : f32 to vector<64x512xf32>
    %7 = arith.maximumf %5, %6 : vector<64x512xf32>
    %c0_6 = arith.constant 0 : index
    %c0_7 = arith.constant 0 : index
    %8 = vector.load %arg4[%c0_6, %c0_7] : memref<32x64xf32, #tpu.memory_space<vmem>>, vector<32x64xf32>
    %cst_8 = arith.constant dense<0.000000e+00> : vector<32x512xf32>
    %9 = tpu.matmul %8, %7, %cst_8 {dimension_numbers = #tpu.dot_dimension_numbers<[1], [0], [0], [1], [0, 0, 1, 1], [], []>} : vector<32x64xf32>, vector<64x512xf32>, vector<32x512xf32> -> vector<32x512xf32>
    %c0_9 = arith.constant 0 : index
    %c0_10 = arith.constant 0 : index
    %10 = vector.load %arg5[%c0_9, %c0_10] : memref<32x1xf32, #tpu.memory_space<vmem>>, vector<32x1xf32>
    %11 = vector.broadcast %10 : vector<32x1xf32> to vector<32x512xf32>
    %12 = arith.addf %9, %11 : vector<32x512xf32>
    %cst_11 = arith.constant 0.000000e+00 : f32
    %13 = vector.broadcast %cst_11 : f32 to vector<32x512xf32>
    %14 = arith.maximumf %12, %13 : vector<32x512xf32>
    %c0_12 = arith.constant 0 : index
    %c0_13 = arith.constant 0 : index
    %15 = vector.load %arg6[%c0_12, %c0_13] : memref<1x32xf32, #tpu.memory_space<vmem>>, vector<1x32xf32>
    %cst_14 = arith.constant dense<0.000000e+00> : vector<1x512xf32>
    %16 = tpu.matmul %15, %14, %cst_14 {dimension_numbers = #tpu.dot_dimension_numbers<[1], [0], [0], [1], [0, 0, 1, 1], [], []>} : vector<1x32xf32>, vector<32x512xf32>, vector<1x512xf32> -> vector<1x512xf32>
    %c0_15 = arith.constant 0 : index
    %c0_16 = arith.constant 0 : index
    %17 = vector.load %arg7[%c0_15, %c0_16] : memref<1x1xf32, #tpu.memory_space<vmem>>, vector<1x1xf32>
    %18 = vector.broadcast %17 : vector<1x1xf32> to vector<1x512xf32>
    %19 = arith.addf %16, %18 : vector<1x512xf32>
    %c0_17 = arith.constant 0 : index
    %c0_18 = arith.constant 0 : index
    %20 = vector.load %arg8[%c0_17, %c0_18] : memref<1x512xf32, #tpu.memory_space<vmem>>, vector<1x512xf32>
    tpu.vector_store %arg8[%c0_17, %c0_18], %19 {strides = array<i32>} : memref<1x512xf32, #tpu.memory_space<vmem>>, vector<1x512xf32>,
    return
  }
  func.func @transform_0(%arg0: i32) -> (i32, i32) {
    %c0_i32 = arith.constant 0 : i32
    %c0_i32_0 = arith.constant 0 : i32
    return %c0_i32, %arg0 : i32, i32
  }
  func.func @transform_1(%arg0: i32) -> (i32, i32) {
    %c0_i32 = arith.constant 0 : i32
    %c0_i32_0 = arith.constant 0 : i32
    %c0_i32_1 = arith.constant 0 : i32
    return %c0_i32, %c0_i32_0 : i32, i32
  }
  func.func @transform_2(%arg0: i32) -> (i32, i32) {
    %c0_i32 = arith.constant 0 : i32
    %c0_i32_0 = arith.constant 0 : i32
    %c0_i32_1 = arith.constant 0 : i32
    return %c0_i32, %c0_i32_0 : i32, i32
  }
  func.func @transform_3(%arg0: i32) -> (i32, i32) {
    %c0_i32 = arith.constant 0 : i32
    %c0_i32_0 = arith.constant 0 : i32
    %c0_i32_1 = arith.constant 0 : i32
    return %c0_i32, %c0_i32_0 : i32, i32
  }
  func.func @transform_4(%arg0: i32) -> (i32, i32) {
    %c0_i32 = arith.constant 0 : i32
    %c0_i32_0 = arith.constant 0 : i32
    %c0_i32_1 = arith.constant 0 : i32
    return %c0_i32, %c0_i32_0 : i32, i32
  }
  func.func @transform_5(%arg0: i32) -> (i32, i32) {
    %c0_i32 = arith.constant 0 : i32
    %c0_i32_0 = arith.constant 0 : i32
    %c0_i32_1 = arith.constant 0 : i32
    return %c0_i32, %c0_i32_0 : i32, i32
  }
  func.func @transform_6(%arg0: i32) -> (i32, i32) {
    %c0_i32 = arith.constant 0 : i32
    %c0_i32_0 = arith.constant 0 : i32
    %c0_i32_1 = arith.constant 0 : i32
    return %c0_i32, %c0_i32_0 : i32, i32
  }
  func.func @transform_7(%arg0: i32) -> (i32, i32) {
    %c0_i32 = arith.constant 0 : i32
    %c0_i32_0 = arith.constant 0 : i32
    return %c0_i32, %arg0 : i32, i32
  }
}

</mosaic_0001>

<bundles_post_ra>
// kernel: complex_regressor_forward.1
= control target key start
LH: loop header
LB: loop body
LE: loop exit
PB: predicated region body
PF: predicated region fallthrough
CT: control target
= control target key end

     0   :  { %s1564_s0 = inlined_call_operand.vmem [shape: f32[8,1024], index: 0, kind: input, shape index: {}]   ;;  %s1565_s1 = inlined_call_operand.vmem [shape: f32[64,8], index: 1, kind: input, shape index: {}]   ;;  %s1566_s2 = inlined_call_operand.vmem [shape: f32[64,1], index: 2, kind: input, shape index: {}]   ;;  %s1567_s3 = inlined_call_operand.vmem [shape: f32[32,64], index: 3, kind: input, shape index: {}]   ;;  %s1568_s4 = inlined_call_operand.vmem [shape: f32[32,1], index: 4, kind: input, shape index: {}]   ;;  %s1569_s5 = inlined_call_operand.vmem [shape: f32[1,32], index: 5, kind: input, shape index: {}]   ;;  %s1570_s6 = inlined_call_operand.<no memory space> [shape: f32[1,1], index: 6, kind: input, shape index: {}]   ;;  %s1571_s7 = inlined_call_operand.hbm [shape: f32[1,1024], index: 7, kind: output, shape index: {}]  }
   0x1   :  { %v12_v0 = vstv %s1570_s6 }
   0x2   :  { %13 = vst [vmem:[#allocation2] sm:$0x1] %v12_v0 }
   0x3   :  { %14 = vsyncpa [#allocation4], 0 }
   0x4   :  { %16 = vsyncpa [#allocation4 + $0x1], 0  ;;  %s1317_s26 = smov 0   ;;  %s1319_s27 = smov 0  }
   0x5   :  { %s1321_s28 = smov 0   ;;  %s1323_s29 = smov 0  }
   0x6 LB: > { %s1338_s6 = sadd.s32 4294967295, %s1268_s29   ;;  %s1125_s30 = sadd.s32 4294967294, %s1268_s29   ;;  %s1268_s29 = sphi %s1323_s29, %s1577_s29   ;;  %s1264_s28 = sphi %s1321_s28, %s1576_s28   ;;  %s1260_s27 = sphi %s1319_s27, %s1575_s27   ;;  %s1256_s26 = sphi %s1317_s26, %s1574_s26  }
   0x7   : > { %s1342_s8 = sadd.s32 1, %s1268_s29   ;;  %s181_s9 = sadd.s32 1, %s1264_s28 }
   0x8   : > { %s178_s10 = ssub.s32 %s1268_s29, %s1342_s8  ;;  %p191_p0 = scmp.ne.s32.totalorder %s1264_s28, %s1260_s27 }
   0x9   : > { %p179_p1 = scmp.eq.s32.totalorder %s178_s10, 0  ;;  %p192_p2 = scmp.eq.s32.totalorder %s1338_s6, 1 }
   0xa   : > { %p197_p3 = scmp.ne.s32.totalorder %s1260_s27, %s1256_s26  ;;  %p198_p4 = scmp.eq.s32.totalorder %s1125_s30, 1 }
   0xb   : > { %s1353_s11 = scalar_select %p179_p1, %s1264_s28, %s181_s9  }
   0xc   : > { %p1355_p5 = por %p192_p2, %p191_p0  ;;  %p1359_p6 = por %p198_p4, %p197_p3 }
   0xd   : > { %p1128_p7 = scmp.ge.s32.totalorder %s1268_s29, 1  ;;  %p243_p8 = scmp.lt.s32.totalorder %s1268_s29, 3 }
   0xf   : > { %p244_p9 = pnand %p1128_p7, %p243_p8 }
  0x10   : > { %s1130_s14 = sshll.u32 (!%p244_p9), %s1338_s6, 2  ;;  %s1163_s30 = sshll.u32 (!%p244_p9), %s1338_s6, 6 }
  0x11   : > { %247 = sbr.rel (%p244_p9) target bundleno = 708 (0x2c4), region = 48  ;;  %p276_p10 = scmp.lt.s32.totalorder (!%p244_p9), %s1130_s14, 7 }
  0x12   : > { %s1064_s16 = scalar_lea.hbm (!%p244_p9), %s1571_s7, %s1163_s30  ;;  %s1273_s19 = smov (!%p244_p9), [#allocation3]  }
  0x13   : > { %s1212_s20 = sshll.u32 (!%p244_p9), %s1273_s19, 4  ;;  %s1213_s20 = int_to_ptr.vmem [resolvable:$false] %s1212_s20 }
  0x14   : > { %s1214_s6 = scalar_lea.vmem (!%p244_p9), %s1213_s20, 128 }
  0x16   : > { %v1270_v1 = vmov 0.0   ;;  %v1271_v2 = vmov 0   ;;  %v299_v3 = vld [vmem:[%s1566_s2 + $0x28] sm:$0xff]  ;;  %s1579_s14 = smov (!%p276_p10, %s1130_s14), 7  ;;  %v301_v4 = vld [vmem:[%s1566_s2 + $0x38] sm:$0xff]  ;;  %v298_v5 = vld [vmem:[%s1566_s2 + $0x20] sm:$0xff] }
  0x17   : > { %431 = vmatprep.mubr.f32.mxu0 %v1270_v1  ;;  %544 = vmatprep.mubr.f32.mxu1 %v1270_v1  ;;  %s1131_s21 = sshll.u32 %s1579_s14, 3  ;;  %v286_v6 = vld [vmem:[%s1565_s1] sm:$0xff]  ;;  %vm342_vm0 = vcmask 64512   ;;  %v300_v11 = vld [vmem:[%s1566_s2 + $0x30] sm:$0xff]  ;;  %v287_v13 = vld [vmem:[%s1565_s1 + $0x8] sm:$0xff]  ;;  %vm653_vm1 = vcmask 523264  }
  0x18   : > { %1207 = vset.pattern.permute.xlu1 %v1271_v2  ;;  %1206 = vset.pattern.permute.xlu0 %v1271_v2  ;;  %s279_s24 = scalar_lea.vmem %s1564_s0, %s1131_s21  ;;  %v296_v12 = vld [vmem:[%s1566_s2 + $0x10] sm:$0xff]  ;;  %v297_v14 = vld [vmem:[%s1566_s2 + $0x18] sm:$0xff]  ;;  %v294_v15 = vld [vmem:[%s1566_s2] sm:$0xff]  ;;  %vm871_vm2 = vcmask 261120  }
  0x19   : > { %329 = vperm.xlu1 %1207, %v299_v3   ;;  %339 = vperm.xlu0 %1206, %v301_v4   ;;  %v283_v7 = vld [vmem:[%s279_s24 + $0x8] sm:$0xff]  ;;  %v285_v8 = vld [vmem:[%s279_s24 + $0x18] sm:$0xff]  ;;  %v282_v9 = vld [vmem:[%s279_s24] sm:$0xff] }
  0x1a   : > { %397 = vmatprep.subr.mxu0 %v283_v7  ;;  %510 = vmatprep.subr.mxu1 %v285_v8  ;;  %v284_v10 = vld [vmem:[%s279_s24 + $0x10] sm:$0xff]  ;;  %v295_v17 = vld [vmem:[%s1566_s2 + $0x8] sm:$0xff]  ;;  %v289_v19 = vld [vmem:[%s1565_s1 + $0x18] sm:$0xff]  ;;  %s272_s24 = sand.u32 1, %s1260_s27  }
  0x1b   : > { %398 = vmatpush1.msra.mxu0 %v282_v9  ;;  %511 = vmatpush1.msra.mxu1 %v284_v10  ;;  %v288_v16 = vld [vmem:[%s1565_s1 + $0x10] sm:$0xff]  ;;  %v632_v20 = vld [vmem:[%s1568_s4 + $0x18] sm:$0xff]  ;;  %v629_v21 = vld [vmem:[%s1568_s4] sm:$0xff]  ;;  %s1129_s25 = sshll.u32 %s272_s24, 2  ;;  %s1052_s17 = scalar_lea.sflag [#allocation4], %s272_s24 }
  0x1c   : > { %1132 = vmatmul.mubr.msk.f32.vlgmr.msra.gmra.mxu0 %vm342_vm0, %v286_v6  ;;  %1140 = vmatmul.mubr.msk.f32.vlgmr.msra.gmra.mxu1 %vm342_vm0, %v286_v6  ;;  %v631_v18 = vld [vmem:[%s1568_s4 + $0x10] sm:$0xff]  ;;  %v290_v22 = vld [vmem:[%s1565_s1 + $0x20] sm:$0xff]  ;;  %v630_v23 = vld [vmem:[%s1568_s4 + $0x8] sm:$0xff]  ;;  %s274_s9 = scalar_lea.vmem [#allocation3], %s1129_s25 }
  0x1d   : > { %324 = vperm.xlu1 %1207, %v298_v5   ;;  %437 = vmatprep.mubr.f32.mxu0 %v1270_v1  ;;  %v291_v24 = vld [vmem:[%s1565_s1 + $0x28] sm:$0xff]  ;;  %v861_v25 = vld [vmem:[#allocation2] sm:$0x1]  ;;  %v292_v26 = vld [vmem:[%s1565_s1 + $0x30] sm:$0xff]  ;;  %s1066_s10 = sshll.u32 %s274_s9, 4  ;;  %s1067_s10 = int_to_ptr.vmem [resolvable:$true] %s1066_s10 }
  0x1e   : > { %550 = vmatprep.mubr.f32.mxu1 %v1270_v1  ;;  %334 = vperm.xlu0 %1206, %v300_v11   ;;  %v293_v27 = vld [vmem:[%s1565_s1 + $0x38] sm:$0xff]  ;;  %s1208_s18 = scalar_lea.vmem %s1067_s10, 64  ;;  %p1215_p0 = scmp.lt.s32.totalorder %s1067_s10, %s1213_s20 }
  0x1f   : > { %p1209_p11 = scmp.ne.s32.totalorder %s1067_s10, %s1208_s18  ;;  %p1216_p1 = scmp.lt.s32.totalorder %s1214_s6, %s1208_s18 }
  0x20   : > { %1133 = vmatmul.mubr.msk.f32.gmra.mxu0 %vm342_vm0, %v287_v13  ;;  %1141 = vmatmul.mubr.msk.f32.gmra.mxu1 %vm342_vm0, %v287_v13 }
  0x21   : > { %314 = vperm.xlu1 %1207, %v296_v12   ;;  %443 = vmatprep.mubr.f32.mxu0 %v1270_v1  ;;  %p1210_p12 = pnand %p1209_p11, %p1355_p5  ;;  %p1217_p2 = por %p1216_p1, %p1215_p0 }
  0x22   : > { %556 = vmatprep.mubr.f32.mxu1 %v1270_v1  ;;  %319 = vperm.xlu0 %1206, %v297_v14  }
  0x23   : > { %p1211_p13 = pneg %p1210_p12 }
  0x24   : > { %1134 = vmatmul.mubr.msk.f32.gmra.mxu0 %vm342_vm0, %v288_v16  ;;  %1142 = vmatmul.mubr.msk.f32.gmra.mxu1 %vm342_vm0, %v288_v16 }
  0x25   : > { %304 = vperm.xlu1 %1207, %v294_v15   ;;  %449 = vmatprep.mubr.f32.mxu0 %v1270_v1  ;;  %p1218_p3 = pnand %p1217_p2, %p1211_p13 }
  0x26   : > { %562 = vmatprep.mubr.f32.mxu1 %v1270_v1  ;;  %309 = vperm.xlu0 %1206, %v295_v17  }
  0x28   : > { %1135 = vmatmul.mubr.msk.f32.gmra.mxu0 %vm342_vm0, %v289_v19  ;;  %1143 = vmatmul.mubr.msk.f32.gmra.mxu1 %vm342_vm0, %v289_v19 }
  0x29   : > { %645 = vperm.xlu1 %1207, %v631_v18   ;;  %455 = vmatprep.mubr.f32.mxu0 %v1270_v1 }
  0x2a   : > { %568 = vmatprep.mubr.f32.mxu1 %v1270_v1  ;;  %650 = vperm.xlu0 %1206, %v632_v20  }
  0x2c   : > { %1136 = vmatmul.mubr.msk.f32.gmra.mxu0 %vm342_vm0, %v290_v22  ;;  %1144 = vmatmul.mubr.msk.f32.gmra.mxu1 %vm342_vm0, %v290_v22 }
  0x2d   : > { %635 = vperm.xlu1 %1207, %v629_v21   ;;  %461 = vmatprep.mubr.f32.mxu0 %v1270_v1 }
  0x2e   : > { %574 = vmatprep.mubr.f32.mxu1 %v1270_v1  ;;  %640 = vperm.xlu0 %1206, %v630_v23  }
  0x30   : > { %1137 = vmatmul.mubr.msk.f32.gmra.mxu0 %vm342_vm0, %v291_v24  ;;  %1145 = vmatmul.mubr.msk.f32.gmra.mxu1 %vm342_vm0, %v291_v24 }
  0x31   : > { %467 = vmatprep.mubr.f32.mxu0 %v1270_v1  ;;  %580 = vmatprep.mubr.f32.mxu1 %v1270_v1 }
  0x32   : > { %864 = vperm.xlu0 %1206, %v861_v25  }
  0x34   : > { %1138 = vmatmul.mubr.msk.f32.gmra.mxu0 %vm342_vm0, %v292_v26  ;;  %1146 = vmatmul.mubr.msk.f32.gmra.mxu1 %vm342_vm0, %v292_v26 }
  0x35   : > { %473 = vmatprep.mubr.f32.mxu0 %v1270_v1  ;;  %586 = vmatprep.mubr.f32.mxu1 %v1270_v1 }
  0x38   : > { %1139 = vmatmul.mubr.msk.f32.gmra.mxu0 %vm342_vm0, %v293_v27  ;;  %1147 = vmatmul.mubr.msk.f32.gmra.mxu1 %vm342_vm0, %v293_v27 }
  0x39   : > { %730 = vmatprep.mubr.f32.mxu0 %v1270_v1  ;;  %819 = vmatprep.mubr.f32.mxu1 %v1270_v1 }
  0x94   : > { %v340_v50 = vpop.permute.xlu0 %339  ;;  %v330_v53 = vpop.permute.xlu1 %329 }
  0x98   : > { %v325_v61 = vpop.permute.xlu1 %324 }
  0x99   : > { %v335_v58 = vpop.permute.xlu0 %334 }
  0x9c   : > { %v315_v18 = vpop.permute.xlu1 %314 }
  0x9d   : > { %v320_v9 = vpop.permute.xlu0 %319 }
  0xdc   : > { %v1463_v28 = vpop.f32.mrf.mxu0  ;;  %v1465_v29 = vpop.f32.mrf.mxu1 }
  0xde   : > { %v1467_v30 = vpop.f32.mrf.mxu0  ;;  %v1469_v31 = vpop.f32.mrf.mxu1 }
  0xe0   : > { %v1471_v32 = vpop.f32.mrf.mxu0  ;;  %v1473_v33 = vpop.f32.mrf.mxu1 }
  0xe2   : > { %v1475_v34 = vpop.f32.mrf.mxu0  ;;  %v1477_v35 = vpop.f32.mrf.mxu1 }
  0xe4   : > { %v1479_v36 = vpop.f32.mrf.mxu0  ;;  %v1481_v37 = vpop.f32.mrf.mxu1 }
  0xe6   : > { %v1483_v38 = vpop.f32.mrf.mxu0  ;;  %v1485_v39 = vpop.f32.mrf.mxu1 }
  0xe8   : > { %v451_v40 = vpop.f32.mrf.mxu0  ;;  %v564_v41 = vpop.f32.mrf.mxu1 }
  0xea   : > { %v453_v42 = vpop.f32.mrf.mxu0  ;;  %v566_v43 = vpop.f32.mrf.mxu1 }
  0xeb   : > { %v454_v27 = vadd.f32 %v453_v42, %v320_v9  ;;  %v446_v42 = vadd.f32 %v1479_v36, %v315_v18 }
  0xec   : > { %v457_v44 = vpop.f32.mrf.mxu0  ;;  %v570_v45 = vpop.f32.mrf.mxu1 }
  0xed   : > { %v458_v23 = vadd.f32 %v457_v44, %v325_v61  ;;  %v571_v24 = vadd.f32 %v570_v45, %v325_v61  ;;  %v448_v44 = vadd.f32 %v1483_v38, %v315_v18  ;;  %v561_v45 = vadd.f32 %v1485_v39, %v315_v18 }
  0xee   : > { %v459_v46 = vpop.f32.mrf.mxu0  ;;  %v572_v47 = vpop.f32.mrf.mxu1  ;;  %v606_v38 = vmax.f32 %v454_v27, 0.0 }
  0xef   : > { %v460_v19 = vadd.f32 %v459_v46, %v325_v61  ;;  %v573_v20 = vadd.f32 %v572_v47, %v325_v61 }
  0xf0   : > { %v463_v48 = vpop.f32.mrf.mxu0  ;;  %v576_v49 = vpop.f32.mrf.mxu1 }
  0xf1   : > { %v464_v14 = vadd.f32 %v463_v48, %v330_v53  ;;  %v577_v15 = vadd.f32 %v576_v49, %v330_v53  ;;  %v452_v49 = vadd.f32 %v451_v40, %v320_v9  ;;  %v611_v40 = vmax.f32 %v571_v24, 0.0 }
  0xf2   : > { %v465_v51 = vpop.f32.mrf.mxu0  ;;  %v578_v52 = vpop.f32.mrf.mxu1 }
  0xf3   : > { %v466_v10 = vadd.f32 %v465_v51, %v330_v53  ;;  %v579_v11 = vadd.f32 %v578_v52, %v330_v53  ;;  %v565_v52 = vadd.f32 %v564_v41, %v320_v9  ;;  %v613_v46 = vmax.f32 %v464_v14, 0.0  ;;  %v310_v53 = vpop.permute.xlu0 %309  ;;  %v305_v41 = vpop.permute.xlu1 %304 }
  0xf4   : > { %v469_v54 = vpop.f32.mrf.mxu0  ;;  %v582_v55 = vpop.f32.mrf.mxu1  ;;  %v615_v47 = vmax.f32 %v577_v15, 0.0  ;;  %v440_v39 = vadd.f32 %v1471_v32, %v310_v53  ;;  %v605_v36 = vmax.f32 %v452_v49, 0.0 }
  0xf5   : > { %v470_v7 = vadd.f32 %v469_v54, %v335_v58  ;;  %v583_v8 = vadd.f32 %v582_v55, %v335_v58  ;;  %v614_v51 = vmax.f32 %v466_v10, 0.0  ;;  %v616_v48 = vmax.f32 %v579_v11, 0.0 }
  0xf6   : > { %v471_v56 = vpop.f32.mrf.mxu0  ;;  %v584_v57 = vpop.f32.mrf.mxu1  ;;  %v610_v54 = vmax.f32 %v460_v19, 0.0  ;;  %v612_v55 = vmax.f32 %v573_v20, 0.0  ;;  %v607_v61 = vmax.f32 %v565_v52, 0.0 }
  0xf7   : > { %v472_v3 = vadd.f32 %v471_v56, %v335_v58  ;;  %v585_v4 = vadd.f32 %v584_v57, %v335_v58  ;;  %v617_v25 = vmax.f32 %v470_v7, 0.0  ;;  %v619_v26 = vmax.f32 %v583_v8, 0.0  ;;  %v626_v7 = vld [vmem:[%s1567_s3 + $0x8] sm:$0xff]  ;;  %v627_v8 = vld [vmem:[%s1567_s3 + $0x10] sm:$0xff]  ;;  %v651_v20 = vpop.permute.xlu0 %650 }
  0xf8   : > { %v475_v59 = vpop.f32.mrf.mxu0  ;;  %v588_v60 = vpop.f32.mrf.mxu1  ;;  %v609_v56 = vmax.f32 %v458_v23, 0.0  ;;  %v442_v57 = vadd.f32 %v1475_v34, %v310_v53  ;;  %v555_v58 = vadd.f32 %v1477_v35, %v310_v53  ;;  %v604_v34 = vmax.f32 %v561_v45, 0.0 }
  0xf9   : > { %v476_v62 = vadd.f32 %v475_v59, %v340_v50  ;;  %v589_v63 = vadd.f32 %v588_v60, %v340_v50  ;;  %v618_v21 = vmax.f32 %v472_v3, 0.0  ;;  %v620_v22 = vmax.f32 %v585_v4, 0.0  ;;  %v646_v23 = vpop.permute.xlu1 %645 }
  0xfa   : > { %v477_v0 = vpop.f32.mrf.mxu0  ;;  %v590_v2 = vpop.f32.mrf.mxu1  ;;  %v553_v60 = vadd.f32 %v1473_v33, %v310_v53  ;;  %v434_v35 = vadd.f32 %v1463_v28, %v305_v41  ;;  %v598_v33 = vmax.f32 %v442_v57, 0.0  ;;  %v600_v3 = vmax.f32 %v555_v58, 0.0 }
  0xfb   : > { %v478_v5 = vadd.f32 %v477_v0, %v340_v50  ;;  %v591_v6 = vadd.f32 %v590_v2, %v340_v50  ;;  %v621_v16 = vmax.f32 %v476_v62, 0.0  ;;  %v623_v17 = vmax.f32 %v589_v63, 0.0 }
  0xfc   : > { %v567_v50 = vadd.f32 %v566_v43, %v320_v9  ;;  %v559_v43 = vadd.f32 %v1481_v37, %v315_v18  ;;  %v436_v37 = vadd.f32 %v1467_v30, %v305_v41  ;;  %v549_v62 = vadd.f32 %v1469_v31, %v305_v41  ;;  %v628_v9 = vld [vmem:[%s1567_s3 + $0x18] sm:$0xff] }
  0xfd   : > { %v622_v12 = vmax.f32 %v478_v5, 0.0  ;;  %v624_v13 = vmax.f32 %v591_v6, 0.0  ;;  %v602_v63 = vmax.f32 %v448_v44, 0.0  ;;  %v547_v0 = vadd.f32 %v1465_v29, %v305_v41  ;;  %v625_v29 = vld [vmem:[%s1567_s3] sm:$0xff] }
  0xfe   : > { %v608_v59 = vmax.f32 %v567_v50, 0.0  ;;  %v601_v2 = vmax.f32 %v446_v42, 0.0  ;;  %v603_v32 = vmax.f32 %v559_v43, 0.0  ;;  %v597_v4 = vmax.f32 %v440_v39, 0.0  ;;  %v636_v42 = vpop.permute.xlu1 %635 }
  0xff   : > { %682 = vmatprep.subr.mxu0 %v622_v12  ;;  %771 = vmatprep.subr.mxu1 %v624_v13  ;;  %v599_v30 = vmax.f32 %v553_v60, 0.0  ;;  %v594_v31 = vmax.f32 %v436_v37, 0.0  ;;  %v596_v5 = vmax.f32 %v549_v62, 0.0  ;;  %v593_v6 = vmax.f32 %v434_v35, 0.0 }
 0x100   : > { %683 = vmatpush1.msra.mxu0 %v621_v16  ;;  %772 = vmatpush1.msra.mxu1 %v623_v17  ;;  %v595_v28 = vmax.f32 %v547_v0, 0.0 }
 0x101   : > { %684 = vmatprep.subr.mxu0 %v618_v21  ;;  %773 = vmatprep.subr.mxu1 %v620_v22 }
 0x102   : > { %685 = vmatpush1.msra.mxu0 %v617_v25  ;;  %774 = vmatpush1.msra.mxu1 %v619_v26 }
 0x103   : > { %686 = vmatprep.subr.mxu0 %v614_v51  ;;  %775 = vmatprep.subr.mxu1 %v616_v48 }
 0x104   : > { %687 = vmatpush1.msra.mxu0 %v613_v46  ;;  %776 = vmatpush1.msra.mxu1 %v615_v47  ;;  %v641_v46 = vpop.permute.xlu0 %640 }
 0x105   : > { %688 = vmatprep.subr.mxu0 %v610_v54  ;;  %777 = vmatprep.subr.mxu1 %v612_v55 }
 0x106   : > { %689 = vmatpush1.msra.mxu0 %v609_v56  ;;  %778 = vmatpush1.msra.mxu1 %v611_v40 }
 0x107   : > { %690 = vmatprep.subr.mxu0 %v606_v38  ;;  %779 = vmatprep.subr.mxu1 %v608_v59 }
 0x108   : > { %691 = vmatpush1.msra.mxu0 %v605_v36  ;;  %780 = vmatpush1.msra.mxu1 %v607_v61 }
 0x109   : > { %692 = vmatprep.subr.mxu0 %v602_v63  ;;  %781 = vmatprep.subr.mxu1 %v604_v34 }
 0x10a   : > { %693 = vmatpush1.msra.mxu0 %v601_v2  ;;  %782 = vmatpush1.msra.mxu1 %v603_v32 }
 0x10b   : > { %694 = vmatprep.subr.mxu0 %v598_v33  ;;  %783 = vmatprep.subr.mxu1 %v600_v3  ;;  %v860_v33 = vld [vmem:[%s1569_s5] sm:$0x1]  ;;  %v867_v3 = vlaneseq }
 0x10c   : > { %695 = vmatpush1.msra.mxu0 %v597_v4  ;;  %784 = vmatpush1.msra.mxu1 %v599_v30  ;;  %v1272_v30 = vmov 1966171168  }
 0x10d   : > { %696 = vmatprep.subr.mxu0 %v594_v31  ;;  %785 = vmatprep.subr.mxu1 %v596_v5  ;;  %v868_v4 = vshrl.u32 %v867_v3, 7  ;;  %v1024_v31 = vunpack.c.l.s4 %v1272_v30  ;;  %vm1048_vm3 = vcmp.lt.s32.totalorder %v867_v3, 512 }
 0x10e   : > { %697 = vmatpush1.msra.mxu0 %v593_v6  ;;  %786 = vmatpush1.msra.mxu1 %v595_v28  ;;  %v865_v28 = vpop.permute.xlu0 %864 }
 0x10f   : > { %1148 = vmatmul.mubr.msk.f32.vlgmr.msra.gmra.mxu0 %vm653_vm1, %v625_v29  ;;  %1152 = vmatmul.mubr.msk.f32.vlgmr.msra.gmra.mxu1 %vm653_vm1, %v625_v29  ;;  %v869_v5 = vsub.s32 0, %v868_v4  ;;  %v1025_v6 = vunpack.c.0.s8 %v1024_v31 }
 0x110   : > { %736 = vmatprep.mubr.f32.mxu0 %v1270_v1  ;;  %825 = vmatprep.mubr.f32.mxu1 %v1270_v1 }
 0x113   : > { %1149 = vmatmul.mubr.msk.f32.gmra.mxu0 %vm653_vm1, %v626_v7  ;;  %1153 = vmatmul.mubr.msk.f32.gmra.mxu1 %vm653_vm1, %v626_v7 }
 0x114   : > { %742 = vmatprep.mubr.f32.mxu0 %v1270_v1  ;;  %831 = vmatprep.mubr.f32.mxu1 %v1270_v1 }
 0x117   : > { %1150 = vmatmul.mubr.msk.f32.gmra.mxu0 %vm653_vm1, %v627_v8  ;;  %1154 = vmatmul.mubr.msk.f32.gmra.mxu1 %vm653_vm1, %v627_v8  ;;  %v870_v8 = vrot.slane %v865_v28, %v869_v5 }
 0x118   : > { %748 = vmatprep.mubr.f32.mxu0 %v1270_v1  ;;  %837 = vmatprep.mubr.f32.mxu1 %v1270_v1 }
 0x11b   : > { %1151 = vmatmul.mubr.msk.f32.gmra.mxu0 %vm653_vm1, %v628_v9  ;;  %1155 = vmatmul.mubr.msk.f32.gmra.mxu1 %vm653_vm1, %v628_v9  ;;  %v1028_v9 = vsub.s32 %v1025_v6, %v868_v4 }
 0x11c   : > { %939 = vmatprep.mubr.f32.mxu0 %v1270_v1  ;;  %1010 = vmatprep.mubr.f32.mxu1 %v1270_v1 }
 0x1cf   : > { %v732_v10 = vpop.f32.mrf.mxu0  ;;  %v821_v11 = vpop.f32.mrf.mxu1 }
 0x1d0   : > { %v733_v39 = vadd.f32 %v732_v10, %v636_v42  ;;  %v822_v60 = vadd.f32 %v821_v11, %v636_v42 }
 0x1d1   : > { %v734_v12 = vpop.f32.mrf.mxu0  ;;  %v823_v13 = vpop.f32.mrf.mxu1 }
 0x1d2   : > { %v735_v57 = vadd.f32 %v734_v12, %v636_v42  ;;  %v824_v58 = vadd.f32 %v823_v13, %v636_v42  ;;  %v844_v2 = vmax.f32 %v733_v39, 0.0  ;;  %v846_v32 = vmax.f32 %v822_v60, 0.0 }
 0x1d3   : > { %v738_v14 = vpop.f32.mrf.mxu0  ;;  %v827_v15 = vpop.f32.mrf.mxu1 }
 0x1d4   : > { %v739_v43 = vadd.f32 %v738_v14, %v641_v46  ;;  %v828_v56 = vadd.f32 %v827_v15, %v641_v46  ;;  %v845_v35 = vmax.f32 %v735_v57, 0.0  ;;  %v847_v0 = vmax.f32 %v824_v58, 0.0 }
 0x1d5   : > { %v740_v16 = vpop.f32.mrf.mxu0  ;;  %v829_v17 = vpop.f32.mrf.mxu1 }
 0x1d6   : > { %v741_v44 = vadd.f32 %v740_v16, %v641_v46  ;;  %v830_v45 = vadd.f32 %v829_v17, %v641_v46  ;;  %v848_v63 = vmax.f32 %v739_v43, 0.0  ;;  %v850_v34 = vmax.f32 %v828_v56, 0.0 }
 0x1d7   : > { %v744_v18 = vpop.f32.mrf.mxu0  ;;  %v833_v19 = vpop.f32.mrf.mxu1 }
 0x1d8   : > { %v745_v47 = vadd.f32 %v744_v18, %v646_v23  ;;  %v834_v53 = vadd.f32 %v833_v19, %v646_v23  ;;  %v849_v37 = vmax.f32 %v741_v44, 0.0  ;;  %v851_v62 = vmax.f32 %v830_v45, 0.0 }
 0x1d9   : > { %v746_v21 = vpop.f32.mrf.mxu0  ;;  %v835_v22 = vpop.f32.mrf.mxu1 }
 0x1da   : > { %v747_v51 = vadd.f32 %v746_v21, %v646_v23  ;;  %v836_v48 = vadd.f32 %v835_v22, %v646_v23  ;;  %v852_v36 = vmax.f32 %v745_v47, 0.0  ;;  %v854_v61 = vmax.f32 %v834_v53, 0.0 }
 0x1db   : > { %v750_v24 = vpop.f32.mrf.mxu0  ;;  %v839_v25 = vpop.f32.mrf.mxu1 }
 0x1dc   : > { %v751_v26 = vadd.f32 %v750_v24, %v651_v20  ;;  %v840_v27 = vadd.f32 %v839_v25, %v651_v20  ;;  %v853_v38 = vmax.f32 %v747_v51, 0.0  ;;  %v855_v59 = vmax.f32 %v836_v48, 0.0 }
 0x1dd   : > { %v752_v50 = vpop.f32.mrf.mxu0  ;;  %v841_v1 = vpop.f32.mrf.mxu1 }
 0x1de   : > { %v753_v49 = vadd.f32 %v752_v50, %v651_v20  ;;  %v842_v52 = vadd.f32 %v841_v1, %v651_v20  ;;  %v856_v40 = vmax.f32 %v751_v26, 0.0  ;;  %v858_v41 = vmax.f32 %v840_v27, 0.0 }
 0x1e0   : > { %v857_v54 = vmax.f32 %v753_v49, 0.0  ;;  %v859_v55 = vmax.f32 %v842_v52, 0.0 }
 0x1e2   : > { %899 = vmatprep.subr.mxu0 %v857_v54  ;;  %970 = vmatprep.subr.mxu1 %v859_v55 }
 0x1e3   : > { %900 = vmatpush1.msra.mxu0 %v856_v40  ;;  %971 = vmatpush1.msra.mxu1 %v858_v41 }
 0x1e4   : > { %901 = vmatprep.subr.mxu0 %v853_v38  ;;  %972 = vmatprep.subr.mxu1 %v855_v59 }
 0x1e5   : > { %902 = vmatpush1.msra.mxu0 %v852_v36  ;;  %973 = vmatpush1.msra.mxu1 %v854_v61 }
 0x1e6   : > { %903 = vmatprep.subr.mxu0 %v849_v37  ;;  %974 = vmatprep.subr.mxu1 %v851_v62 }
 0x1e7   : > { %904 = vmatpush1.msra.mxu0 %v848_v63  ;;  %975 = vmatpush1.msra.mxu1 %v850_v34 }
 0x1e8   : > { %905 = vmatprep.subr.mxu0 %v845_v35  ;;  %976 = vmatprep.subr.mxu1 %v847_v0 }
 0x1e9   : > { %906 = vmatpush1.msra.mxu0 %v844_v2  ;;  %977 = vmatpush1.msra.mxu1 %v846_v32 }
 0x1ea   : > { %1156 = vmatmul.mubr.msk.f32.vlgmr.msra.gmra.mxu0 %vm871_vm2, %v860_v33  ;;  %1157 = vmatmul.mubr.msk.f32.vlgmr.msra.gmra.mxu1 %vm871_vm2, %v860_v33 }
 0x2aa   : > { %v941_v29 = vpop.f32.mrf.mxu0  ;;  %v1012_v7 = vpop.f32.mrf.mxu1 }
 0x2ab   : > { %v942_v12 = vadd.f32 %v941_v29, %v870_v8  ;;  %v1013_v13 = vadd.f32 %v1012_v7, %v870_v8 }
 0x2ac   : > { %v943_v10 = vpop.f32.mrf.mxu0  ;;  %v1014_v11 = vpop.f32.mrf.mxu1 }
 0x2ad   : > { %v944_v14 = vadd.f32 %v943_v10, %v870_v8  ;;  %v1015_v15 = vadd.f32 %v1014_v11, %v870_v8 }
 0x2af   : > { %v1021_v16 = vcombine.low %v942_v12, %v944_v14  ;;  %v1022_v17 = vcombine.low %v1013_v13, %v1015_v15 }
 0x2b1   : > { %v1029_v18 = vrot.slane %v1021_v16, %v1028_v9  ;;  %v1036_v19 = vrot.slane %v1022_v17, %v1028_v9 }
 0x2b3   : > { %v1037_v20 = vcombine.low %v1029_v18, %v1036_v19 }
 0x2b5   : > { %v1044_v21 = vrot.slane %v1037_v20, %v1028_v9 }
 0x2b7   : > { %1050 = vst.msk [vmem:[%s274_s9] sm:$0xf] %vm1048_vm3, %v1044_v21 }
 0x2b8   : > { %1221 = shalt.err (!%p1218_p3)
}
 0x2b9   : > { %s1222_s21 = scalar_lea.hbm %s1064_s16, 64  ;;  %s1226_s24 = scalar_lea.hbm %s1571_s7, 128 }
 0x2ba   : > { %p1223_p4 = scmp.ne.s32.totalorder %s1064_s16, %s1222_s21  ;;  %p1227_p9 = scmp.lt.s32.totalorder %s1064_s16, %s1571_s7 }
 0x2bb   : > { %p1228_p10 = scmp.lt.s32.totalorder %s1226_s24, %s1222_s21 }
 0x2bc   : > { %p1224_p7 = pnand %p1223_p4, %p1355_p5 }
 0x2bd   : > { %p1229_p11 = por %p1228_p10, %p1227_p9 }
 0x2be   : > { %p1225_p8 = pneg %p1224_p7 }
 0x2c0   : > { %p1230_p12 = pnand %p1229_p11, %p1225_p8 }
 0x2c2   : > { %1233 = shalt.err (!%p1230_p12)
}
 0x2c3   : > { %1164 = dma.vmem_to_hbm [thread:$0]  (%p1355_p5), %s1067_s10, 64, %s1064_s16, %s1052_s17  }
 0x2c4 PF: > { %p1170_p13 = scmp.ge.s32.totalorder %s1268_s29, 2  ;;  %s1078_s9 = sand.u32 1, %s1256_s26  }
 0x2c5   : > { %s1079_s14 = scalar_lea.sflag [#allocation4], %s1078_s9 }
 0x2c6   : > { %p1167_p0 = pnand %p1170_p13, %p1359_p6 }
 0x2c8   : > { %p1168_p1 = pneg %p1167_p0 }
 0x2ca   : > { %1251 = dma.done.wait (%p1168_p1), %s1079_s14, 64  }
 0x2cb   : > { %1253 = vsyncadd (%p1168_p1), %s1079_s14, 4294967232  ;;  %p19_p2 = scmp.ge.s32.totalorder %s1342_s8, 4   ;;  %s1574_s26 = smov %s1260_s27 }
 0x2cc   : > { %s1575_s27 = smov %s1264_s28  ;;  %s1576_s28 = smov %s1353_s11 }
 0x2cd   : > { %s1577_s29 = smov %s1342_s8  ;;  %21 = sbr.rel (!%p19_p2) target bundleno = 6 (0x6), region = 83 }
 0x2d2   :  { %1084 = vsyncpa [#allocation4], 1 }
 0x2d3   :  { %1086 = vsyncpa [#allocation4 + $0x1], 1 }

</bundles_post_ra>
